<compile_context>
chip_gen: v6e
topology: v6e:2x2x1
jax: 0.10.0
libtpu: 0.0.40
codegen_flags: <defaults>
</compile_context>

<pallas_src>
import functools

import jax
import jax.numpy as jnp
from jax import lax
from jax.experimental import pallas as pl
from jax.experimental.pallas import tpu as pltpu


_HALO = 8  # top halo rows in the h1 staging scratch -> sublane-aligned interior store


# ----------------------------------------------------------------------------
# Fused kernel: conv1+bn1+relu -> conv2+bn2 -> +residual -> relu
# ----------------------------------------------------------------------------
def _basic_block_kernel(xpad_ref, bw1_ref, s1_ref, b1_ref,
                        bw2_ref, s2_ref, b2_ref,
                        out_ref, h1_ref, *, H, WC, atrous):
    # xpad_ref : (1, H + 2*atrous, W*C)  lane-dense input, H zero-padded by atrous
    # bw1_ref  : (3, W*C, W*C)           banded conv1 weights (kw taps + W-pad folded in)
    # s1/b1    : (1, W*C)                folded BN1 affine, tiled to lane-dense width
    # bw2_ref  : (3, W*C, W*C)           banded conv2 weights
    # s2/b2    : (1, W*C)                folded BN2 affine
    # out_ref  : (1, H, W*C)             lane-dense output slab
    # h1_ref   : VMEM (_HALO + H + 8, W*C)  relu(bn1(conv1)) staging with zero halo rows

    # ---- conv1 (3x3, dilation=atrous): 3 banded matmuls on lane-dense rows ----
    acc = jnp.dot(xpad_ref[0, 0:H, :], bw1_ref[0],
                  preferred_element_type=jnp.float32)
    for kh in (1, 2):
        acc = acc + jnp.dot(xpad_ref[0, kh * atrous:kh * atrous + H, :],
                            bw1_ref[kh], preferred_element_type=jnp.float32)
    h1 = jnp.maximum(acc * s1_ref[...] + b1_ref[...], 0.0)          # BN1 + ReLU

    # ---- stage h1 with zero halo rows (all stores sublane-aligned) ----------
    h1_ref[0:_HALO, :] = jnp.zeros((_HALO, WC), jnp.float32)        # top halo block
    h1_ref[_HALO + H:_HALO + H + 8, :] = jnp.zeros((8, WC), jnp.float32)  # bottom halo
    h1_ref[_HALO:_HALO + H, :] = h1                                  # aligned interior

    # ---- conv2 (3x3, dilation=1): 3 banded matmuls ---------------------------
    acc2 = jnp.dot(h1_ref[_HALO - 1:_HALO - 1 + H, :], bw2_ref[0],
                   preferred_element_type=jnp.float32)
    for kh in (1, 2):
        acc2 = acc2 + jnp.dot(h1_ref[_HALO - 1 + kh:_HALO - 1 + kh + H, :],
                              bw2_ref[kh], preferred_element_type=jnp.float32)

    # ---- BN2 + residual (reused from the resident padded tile) + ReLU --------
    res = xpad_ref[0, atrous:atrous + H, :]                          # == original x
    out_ref[0] = jnp.maximum(acc2 * s2_ref[...] + b2_ref[...] + res,
                             0.0).astype(out_ref.dtype)


# ----------------------------------------------------------------------------
# Banded ("Toeplitz") weight construction: fold the 3 kw taps and the
# W-direction zero padding of a 3x3 conv into per-kh (W*Cin, W*Cout) matrices.
# ----------------------------------------------------------------------------
def _banded_weight(w_hwio, W, dil):
    _, _, Cin, Cout = w_hwio.shape
    wi = jnp.arange(W)
    kw = jnp.arange(3)
    src = wi[None, :] + (kw[:, None] - 1) * dil          # (3, W): input column per tap
    valid = (src >= 0) & (src < W)                       # taps falling in the zero pad drop out
    src = jnp.clip(src, 0, W - 1)
    p = jnp.arange(W)
    sel = ((p[None, :, None] == src[:, None, :]) & valid[:, None, :]).astype(w_hwio.dtype)
    # banded[kh, p*Cin + ci, w*Cout + co] = sum_kw sel[kw, p, w] * w[kh, kw, ci, co]
    banded = jnp.einsum('kpw,hkio->hpiwo', sel, w_hwio)  # (3, W, Cin, W, Cout)
    return banded.reshape(3, W * Cin, W * Cout)


# ----------------------------------------------------------------------------
# BasicBlock forward (public interface: NCHW, like the PyTorch module)
# ----------------------------------------------------------------------------
def basic_block_forward(x_nchw, params, *, atrous=1):
    # NOTE: if the surrounding pipeline can stay NHWC these transposes are pure
    # layout plumbing and should be removed at the caller level.
    x = jnp.transpose(x_nchw, (0, 2, 3, 1)).astype(jnp.float32)      # NHWC
    B, H, W, C = x.shape
    Cout = params["w1"].shape[-1]
    assert C == Cout, "downsample=None path requires inplanes == planes"
    WC = W * C

    # Lane-dense layout (B, H, W*C); only H is padded (W-halo folded into weights).
    xpad = jnp.pad(x.reshape(B, H, WC), ((0, 0), (atrous, atrous), (0, 0)))
    Hp = H + 2 * atrous

    bw1 = _banded_weight(params["w1"].astype(jnp.float32), W, atrous)
    bw2 = _banded_weight(params["w2"].astype(jnp.float32), W, 1)
    s1 = jnp.tile(params["scale1"].astype(jnp.float32), W).reshape(1, WC)
    b1 = jnp.tile(params["bias1"].astype(jnp.float32), W).reshape(1, WC)
    s2 = jnp.tile(params["scale2"].astype(jnp.float32), W).reshape(1, WC)
    b2 = jnp.tile(params["bias2"].astype(jnp.float32), W).reshape(1, WC)

    kernel = functools.partial(_basic_block_kernel, H=H, WC=WC, atrous=atrous)

    out_flat = pl.pallas_call(
        kernel,
        out_shape=jax.ShapeDtypeStruct((B, H, WC), jnp.float32),
        grid_spec=pltpu.PrefetchScalarGridSpec(
            num_scalar_prefetch=0,
            grid=(B,),
            in_specs=[
                pl.BlockSpec((1, Hp, WC), lambda b: (b, 0, 0)),     # padded input
                pl.BlockSpec((3, WC, WC), lambda b: (0, 0, 0)),     # banded conv1 weights
                pl.BlockSpec((1, WC), lambda b: (0, 0)),            # bn1 scale
                pl.BlockSpec((1, WC), lambda b: (0, 0)),            # bn1 bias
                pl.BlockSpec((3, WC, WC), lambda b: (0, 0, 0)),     # banded conv2 weights
                pl.BlockSpec((1, WC), lambda b: (0, 0)),            # bn2 scale
                pl.BlockSpec((1, WC), lambda b: (0, 0)),            # bn2 bias
            ],
            out_specs=pl.BlockSpec((1, H, WC), lambda b: (b, 0, 0)),
            scratch_shapes=[
                pltpu.VMEM((_HALO + H + 8, WC), jnp.float32),       # h1 + zero halo rows
            ],
        ),
        compiler_params=pltpu.CompilerParams(
            dimension_semantics=("parallel",)),
    )(xpad, bw1, s1, b1, bw2, s2, b2)

    out = out_flat.reshape(B, H, W, C)
    return jnp.transpose(out, (0, 3, 1, 2))   # back to NCHW


# ----------------------------------------------------------------------------
# Pure-JAX reference (for correctness check)
# ----------------------------------------------------------------------------
def basic_block_reference(x_nchw, params, *, atrous=1):
    def conv(x, w, pad, dil):
        return lax.conv_general_dilated(
            x, w, window_strides=(1, 1),
            padding=((pad, pad), (pad, pad)),
            rhs_dilation=(dil, dil),
            dimension_numbers=("NCHW", "HWIO", "NCHW"),
            precision=lax.Precision.HIGHEST)

    def bn(x, s, b):
        return x * s[None, :, None, None] + b[None, :, None, None]

    y = conv(x_nchw, params["w1"], atrous, atrous)
    y = jnp.maximum(bn(y, params["scale1"], params["bias1"]), 0.0)
    y = conv(y, params["w2"], 1, 1)
    y = bn(y, params["scale2"], params["bias2"]) + x_nchw
    return jnp.maximum(y, 0.0)


# ----------------------------------------------------------------------------
# Deterministic parameter construction (BasicBlock(inplanes=C, planes=C))
# ----------------------------------------------------------------------------
def make_params(key, inplanes, planes, eps=1e-5):
    ks = jax.random.split(key, 10)

    def fold_bn(gamma, beta, mean, var):
        scale = gamma / jnp.sqrt(var + eps)
        return scale, beta - mean * scale

    w1 = 0.1 * jax.random.normal(ks[0], (3, 3, inplanes, planes), jnp.float32)
    w2 = 0.1 * jax.random.normal(ks[1], (3, 3, planes, planes), jnp.float32)

    g1 = 1.0 + 0.1 * jax.random.normal(ks[2], (planes,), jnp.float32)
    b1 = 0.1 * jax.random.normal(ks[3], (planes,), jnp.float32)
    m1 = 0.1 * jax.random.normal(ks[4], (planes,), jnp.float32)
    v1 = 1.0 + 0.1 * jnp.abs(jax.random.normal(ks[5], (planes,), jnp.float32))

    g2 = 1.0 + 0.1 * jax.random.normal(ks[6], (planes,), jnp.float32)
    b2 = 0.1 * jax.random.normal(ks[7], (planes,), jnp.float32)
    m2 = 0.1 * jax.random.normal(ks[8], (planes,), jnp.float32)
    v2 = 1.0 + 0.1 * jnp.abs(jax.random.normal(ks[9], (planes,), jnp.float32))

    s1, bb1 = fold_bn(g1, b1, m1, v1)
    s2, bb2 = fold_bn(g2, b2, m2, v2)
    return {"w1": w1, "scale1": s1, "bias1": bb1,
            "w2": w2, "scale2": s2, "bias2": bb2}


if __name__ == "__main__":
    # inplanes = planes = 8 (downsample=None path); W*C = 128 -> lane-dense rows.
    B, C, H, W = 2, 8, 16, 16
    key = jax.random.PRNGKey(0)
    kx, kp = jax.random.split(key)
    x = jax.random.normal(kx, (B, C, H, W), jnp.float32)   # NCHW, like PyTorch
    params = make_params(kp, C, C)

    out = jax.block_until_ready(basic_block_forward(x, params, atrous=1))
    ref = jax.block_until_ready(basic_block_reference(x, params, atrous=1))
    assert out.shape == (B, C, H, W)
    # Default MXU precision rounds operands to bf16; with O(1) activations and
    # effective K = 3*C per tap the error is comfortably below 5e-2.
    err = float(jnp.max(jnp.abs(out - ref)))
    assert err < 5e-2, err

    # Dilated path (atrous=2), still stride=1 / downsample=None.
    out2 = jax.block_until_ready(basic_block_forward(x, params, atrous=2))
    ref2 = jax.block_until_ready(basic_block_reference(x, params, atrous=2))
    err2 = float(jnp.max(jnp.abs(out2 - ref2)))
    assert err2 < 5e-2, err2

    print("KERNEL_OK")
</pallas_src>

<mosaic_0001>
module attributes {stable_mosaic.version = 11 : i64} {
  func.func @_basic_block_kernel(%arg0: i32, %arg1: memref<1x18x128xf32, #tpu.memory_space<vmem>>, %arg2: memref<3x128x128xf32, #tpu.memory_space<vmem>>, %arg3: memref<1x128xf32, #tpu.memory_space<vmem>>, %arg4: memref<1x128xf32, #tpu.memory_space<vmem>>, %arg5: memref<3x128x128xf32, #tpu.memory_space<vmem>>, %arg6: memref<1x128xf32, #tpu.memory_space<vmem>>, %arg7: memref<1x128xf32, #tpu.memory_space<vmem>>, %arg8: memref<1x16x128xf32, #tpu.memory_space<vmem>>, %arg9: memref<32x128xf32, #tpu.memory_space<vmem>>) attributes {dimension_semantics = [#tpu.dimension_semantics<parallel>], iteration_bounds = array<i64: 2>, scalar_prefetch = 0 : i64, scratch_operands = 1 : i64, tpu.core_type = #tpu.core_type<tc>, window_params = [{transform_indices = @transform_0, window_bounds = array<i64: 1, 18, 128>}, {pipeline_mode = #tpu.pipeline_mode<synchronous>, transform_indices = @transform_1, window_bounds = array<i64: 3, 128, 128>}, {pipeline_mode = #tpu.pipeline_mode<synchronous>, transform_indices = @transform_2, window_bounds = array<i64: 1, 128>}, {pipeline_mode = #tpu.pipeline_mode<synchronous>, transform_indices = @transform_3, window_bounds = array<i64: 1, 128>}, {pipeline_mode = #tpu.pipeline_mode<synchronous>, transform_indices = @transform_4, window_bounds = array<i64: 3, 128, 128>}, {pipeline_mode = #tpu.pipeline_mode<synchronous>, transform_indices = @transform_5, window_bounds = array<i64: 1, 128>}, {pipeline_mode = #tpu.pipeline_mode<synchronous>, transform_indices = @transform_6, window_bounds = array<i64: 1, 128>}, {transform_indices = @transform_7, window_bounds = array<i64: 1, 16, 128>}]} {
    %c0 = arith.constant 0 : index
    %c0_0 = arith.constant 0 : index
    %c0_1 = arith.constant 0 : index
    %0 = vector.load %arg1[%c0, %c0_0, %c0_1] : memref<1x18x128xf32, #tpu.memory_space<vmem>>, vector<1x16x128xf32>
    %1 = vector.shape_cast %0 : vector<1x16x128xf32> to vector<16x128xf32>
    %c0_2 = arith.constant 0 : index
    %c0_3 = arith.constant 0 : index
    %c0_4 = arith.constant 0 : index
    %2 = vector.load %arg2[%c0_2, %c0_3, %c0_4] : memref<3x128x128xf32, #tpu.memory_space<vmem>>, vector<1x128x128xf32>
    %3 = vector.shape_cast %2 : vector<1x128x128xf32> to vector<128x128xf32>
    %cst = arith.constant dense<0.000000e+00> : vector<16x128xf32>
    %4 = tpu.matmul %1, %3, %cst {dimension_numbers = #tpu.dot_dimension_numbers<[1], [0], [0], [1], [0, 0, 1, 1], [], []>} : vector<16x128xf32>, vector<128x128xf32>, vector<16x128xf32> -> vector<16x128xf32>
    %c0_5 = arith.constant 0 : index
    %c1 = arith.constant 1 : index
    %c0_6 = arith.constant 0 : index
    %5 = vector.load %arg1[%c0_5, %c1, %c0_6] : memref<1x18x128xf32, #tpu.memory_space<vmem>>, vector<1x16x128xf32>
    %6 = vector.shape_cast %5 : vector<1x16x128xf32> to vector<16x128xf32>
    %c1_7 = arith.constant 1 : index
    %c0_8 = arith.constant 0 : index
    %c0_9 = arith.constant 0 : index
    %7 = vector.load %arg2[%c1_7, %c0_8, %c0_9] : memref<3x128x128xf32, #tpu.memory_space<vmem>>, vector<1x128x128xf32>
    %8 = vector.shape_cast %7 : vector<1x128x128xf32> to vector<128x128xf32>
    %cst_10 = arith.constant dense<0.000000e+00> : vector<16x128xf32>
    %9 = tpu.matmul %6, %8, %cst_10 {dimension_numbers = #tpu.dot_dimension_numbers<[1], [0], [0], [1], [0, 0, 1, 1], [], []>} : vector<16x128xf32>, vector<128x128xf32>, vector<16x128xf32> -> vector<16x128xf32>
    %10 = arith.addf %4, %9 : vector<16x128xf32>
    %c0_11 = arith.constant 0 : index
    %c2 = arith.constant 2 : index
    %c0_12 = arith.constant 0 : index
    %11 = vector.load %arg1[%c0_11, %c2, %c0_12] : memref<1x18x128xf32, #tpu.memory_space<vmem>>, vector<1x16x128xf32>
    %12 = vector.shape_cast %11 : vector<1x16x128xf32> to vector<16x128xf32>
    %c2_13 = arith.constant 2 : index
    %c0_14 = arith.constant 0 : index
    %c0_15 = arith.constant 0 : index
    %13 = vector.load %arg2[%c2_13, %c0_14, %c0_15] : memref<3x128x128xf32, #tpu.memory_space<vmem>>, vector<1x128x128xf32>
    %14 = vector.shape_cast %13 : vector<1x128x128xf32> to vector<128x128xf32>
    %cst_16 = arith.constant dense<0.000000e+00> : vector<16x128xf32>
    %15 = tpu.matmul %12, %14, %cst_16 {dimension_numbers = #tpu.dot_dimension_numbers<[1], [0], [0], [1], [0, 0, 1, 1], [], []>} : vector<16x128xf32>, vector<128x128xf32>, vector<16x128xf32> -> vector<16x128xf32>
    %16 = arith.addf %10, %15 : vector<16x128xf32>
    %c0_17 = arith.constant 0 : index
    %c0_18 = arith.constant 0 : index
    %17 = vector.load %arg3[%c0_17, %c0_18] : memref<1x128xf32, #tpu.memory_space<vmem>>, vector<1x128xf32>
    %18 = vector.broadcast %17 : vector<1x128xf32> to vector<16x128xf32>
    %19 = arith.mulf %16, %18 : vector<16x128xf32>
    %c0_19 = arith.constant 0 : index
    %c0_20 = arith.constant 0 : index
    %20 = vector.load %arg4[%c0_19, %c0_20] : memref<1x128xf32, #tpu.memory_space<vmem>>, vector<1x128xf32>
    %21 = vector.broadcast %20 : vector<1x128xf32> to vector<16x128xf32>
    %22 = arith.addf %19, %21 : vector<16x128xf32>
    %cst_21 = arith.constant 0.000000e+00 : f32
    %23 = vector.broadcast %cst_21 : f32 to vector<16x128xf32>
    %24 = arith.maximumf %22, %23 : vector<16x128xf32>
    %cst_22 = arith.constant 0.000000e+00 : f32
    %25 = vector.broadcast %cst_22 : f32 to vector<8x128xf32>
    %c0_23 = arith.constant 0 : index
    %c0_24 = arith.constant 0 : index
    %26 = vector.load %arg9[%c0_23, %c0_24] : memref<32x128xf32, #tpu.memory_space<vmem>>, vector<8x128xf32>
    tpu.vector_store %arg9[%c0_23, %c0_24], %25 {strides = array<i32>} : memref<32x128xf32, #tpu.memory_space<vmem>>, vector<8x128xf32>,
    %cst_25 = arith.constant 0.000000e+00 : f32
    %27 = vector.broadcast %cst_25 : f32 to vector<8x128xf32>
    %c24 = arith.constant 24 : index
    %c0_26 = arith.constant 0 : index
    %28 = vector.load %arg9[%c24, %c0_26] : memref<32x128xf32, #tpu.memory_space<vmem>>, vector<8x128xf32>
    tpu.vector_store %arg9[%c24, %c0_26], %27 {strides = array<i32>} : memref<32x128xf32, #tpu.memory_space<vmem>>, vector<8x128xf32>,
    %c8 = arith.constant 8 : index
    %c0_27 = arith.constant 0 : index
    %29 = vector.load %arg9[%c8, %c0_27] : memref<32x128xf32, #tpu.memory_space<vmem>>, vector<16x128xf32>
    tpu.vector_store %arg9[%c8, %c0_27], %24 {strides = array<i32>} : memref<32x128xf32, #tpu.memory_space<vmem>>, vector<16x128xf32>,
    %c7 = arith.constant 7 : index
    %c0_28 = arith.constant 0 : index
    %30 = vector.load %arg9[%c7, %c0_28] : memref<32x128xf32, #tpu.memory_space<vmem>>, vector<16x128xf32>
    %c0_29 = arith.constant 0 : index
    %c0_30 = arith.constant 0 : index
    %c0_31 = arith.constant 0 : index
    %31 = vector.load %arg5[%c0_29, %c0_30, %c0_31] : memref<3x128x128xf32, #tpu.memory_space<vmem>>, vector<1x128x128xf32>
    %32 = vector.shape_cast %31 : vector<1x128x128xf32> to vector<128x128xf32>
    %cst_32 = arith.constant dense<0.000000e+00> : vector<16x128xf32>
    %33 = tpu.matmul %30, %32, %cst_32 {dimension_numbers = #tpu.dot_dimension_numbers<[1], [0], [0], [1], [0, 0, 1, 1], [], []>} : vector<16x128xf32>, vector<128x128xf32>, vector<16x128xf32> -> vector<16x128xf32>
    %c8_33 = arith.constant 8 : index
    %c0_34 = arith.constant 0 : index
    %34 = vector.load %arg9[%c8_33, %c0_34] : memref<32x128xf32, #tpu.memory_space<vmem>>, vector<16x128xf32>
    %c1_35 = arith.constant 1 : index
    %c0_36 = arith.constant 0 : index
    %c0_37 = arith.constant 0 : index
    %35 = vector.load %arg5[%c1_35, %c0_36, %c0_37] : memref<3x128x128xf32, #tpu.memory_space<vmem>>, vector<1x128x128xf32>
    %36 = vector.shape_cast %35 : vector<1x128x128xf32> to vector<128x128xf32>
    %cst_38 = arith.constant dense<0.000000e+00> : vector<16x128xf32>
    %37 = tpu.matmul %34, %36, %cst_38 {dimension_numbers = #tpu.dot_dimension_numbers<[1], [0], [0], [1], [0, 0, 1, 1], [], []>} : vector<16x128xf32>, vector<128x128xf32>, vector<16x128xf32> -> vector<16x128xf32>
    %38 = arith.addf %33, %37 : vector<16x128xf32>
    %c9 = arith.constant 9 : index
    %c0_39 = arith.constant 0 : index
    %39 = vector.load %arg9[%c9, %c0_39] : memref<32x128xf32, #tpu.memory_space<vmem>>, vector<16x128xf32>
    %c2_40 = arith.constant 2 : index
    %c0_41 = arith.constant 0 : index
    %c0_42 = arith.constant 0 : index
    %40 = vector.load %arg5[%c2_40, %c0_41, %c0_42] : memref<3x128x128xf32, #tpu.memory_space<vmem>>, vector<1x128x128xf32>
    %41 = vector.shape_cast %40 : vector<1x128x128xf32> to vector<128x128xf32>
    %cst_43 = arith.constant dense<0.000000e+00> : vector<16x128xf32>
    %42 = tpu.matmul %39, %41, %cst_43 {dimension_numbers = #tpu.dot_dimension_numbers<[1], [0], [0], [1], [0, 0, 1, 1], [], []>} : vector<16x128xf32>, vector<128x128xf32>, vector<16x128xf32> -> vector<16x128xf32>
    %43 = arith.addf %38, %42 : vector<16x128xf32>
    %c0_44 = arith.constant 0 : index
    %c1_45 = arith.constant 1 : index
    %c0_46 = arith.constant 0 : index
    %44 = vector.load %arg1[%c0_44, %c1_45, %c0_46] : memref<1x18x128xf32, #tpu.memory_space<vmem>>, vector<1x16x128xf32>
    %45 = vector.shape_cast %44 : vector<1x16x128xf32> to vector<16x128xf32>
    %c0_47 = arith.constant 0 : index
    %c0_48 = arith.constant 0 : index
    %46 = vector.load %arg6[%c0_47, %c0_48] : memref<1x128xf32, #tpu.memory_space<vmem>>, vector<1x128xf32>
    %47 = vector.broadcast %46 : vector<1x128xf32> to vector<16x128xf32>
    %48 = arith.mulf %43, %47 : vector<16x128xf32>
    %c0_49 = arith.constant 0 : index
    %c0_50 = arith.constant 0 : index
    %49 = vector.load %arg7[%c0_49, %c0_50] : memref<1x128xf32, #tpu.memory_space<vmem>>, vector<1x128xf32>
    %50 = vector.broadcast %49 : vector<1x128xf32> to vector<16x128xf32>
    %51 = arith.addf %48, %50 : vector<16x128xf32>
    %52 = arith.addf %51, %45 : vector<16x128xf32>
    %cst_51 = arith.constant 0.000000e+00 : f32
    %53 = vector.broadcast %cst_51 : f32 to vector<16x128xf32>
    %54 = arith.maximumf %52, %53 : vector<16x128xf32>
    %c0_52 = arith.constant 0 : index
    %c0_53 = arith.constant 0 : index
    %c0_54 = arith.constant 0 : index
    %55 = vector.load %arg8[%c0_52, %c0_53, %c0_54] : memref<1x16x128xf32, #tpu.memory_space<vmem>>, vector<1x16x128xf32>
    %56 = vector.shape_cast %55 : vector<1x16x128xf32> to vector<16x128xf32>
    %57 = vector.shape_cast %54 : vector<16x128xf32> to vector<1x16x128xf32>
    tpu.vector_store %arg8[%c0_52, %c0_53, %c0_54], %57 {strides = array<i32>} : memref<1x16x128xf32, #tpu.memory_space<vmem>>, vector<1x16x128xf32>,
    return
  }
  func.func @transform_0(%arg0: i32) -> (i32, i32, i32) {
    %c0_i32 = arith.constant 0 : i32
    %c0_i32_0 = arith.constant 0 : i32
    %c0_i32_1 = arith.constant 0 : i32
    return %arg0, %c0_i32, %c0_i32_0 : i32, i32, i32
  }
  func.func @transform_1(%arg0: i32) -> (i32, i32, i32) {
    %c0_i32 = arith.constant 0 : i32
    %c0_i32_0 = arith.constant 0 : i32
    %c0_i32_1 = arith.constant 0 : i32
    %c0_i32_2 = arith.constant 0 : i32
    return %c0_i32, %c0_i32_0, %c0_i32_1 : i32, i32, i32
  }
  func.func @transform_2(%arg0: i32) -> (i32, i32) {
    %c0_i32 = arith.constant 0 : i32
    %c0_i32_0 = arith.constant 0 : i32
    %c0_i32_1 = arith.constant 0 : i32
    return %c0_i32, %c0_i32_0 : i32, i32
  }
  func.func @transform_3(%arg0: i32) -> (i32, i32) {
    %c0_i32 = arith.constant 0 : i32
    %c0_i32_0 = arith.constant 0 : i32
    %c0_i32_1 = arith.constant 0 : i32
    return %c0_i32, %c0_i32_0 : i32, i32
  }
  func.func @transform_4(%arg0: i32) -> (i32, i32, i32) {
    %c0_i32 = arith.constant 0 : i32
    %c0_i32_0 = arith.constant 0 : i32
    %c0_i32_1 = arith.constant 0 : i32
    %c0_i32_2 = arith.constant 0 : i32
    return %c0_i32, %c0_i32_0, %c0_i32_1 : i32, i32, i32
  }
  func.func @transform_5(%arg0: i32) -> (i32, i32) {
    %c0_i32 = arith.constant 0 : i32
    %c0_i32_0 = arith.constant 0 : i32
    %c0_i32_1 = arith.constant 0 : i32
    return %c0_i32, %c0_i32_0 : i32, i32
  }
  func.func @transform_6(%arg0: i32) -> (i32, i32) {
    %c0_i32 = arith.constant 0 : i32
    %c0_i32_0 = arith.constant 0 : i32
    %c0_i32_1 = arith.constant 0 : i32
    return %c0_i32, %c0_i32_0 : i32, i32
  }
  func.func @transform_7(%arg0: i32) -> (i32, i32, i32) {
    %c0_i32 = arith.constant 0 : i32
    %c0_i32_0 = arith.constant 0 : i32
    %c0_i32_1 = arith.constant 0 : i32
    return %arg0, %c0_i32, %c0_i32_0 : i32, i32, i32
  }
}

</mosaic_0001>

<bundles_post_ra>
// kernel: tpu_custom_call.1
= control target key start
LH: loop header
LB: loop body
LE: loop exit
PB: predicated region body
PF: predicated region fallthrough
CT: control target
= control target key end

     0   :  { %12 = vsyncpa [#allocation4], 0  ;;  %s1766_s0 = inlined_call_operand.vmem [shape: f32[2,18,128], index: 0, kind: input, shape index: {}]   ;;  %s1767_s1 = inlined_call_operand.hbm [shape: f32[3,128,128], index: 1, kind: input, shape index: {}]   ;;  %s1768_s2 = inlined_call_operand.vmem [shape: f32[1,128], index: 2, kind: input, shape index: {}]   ;;  %s1769_s3 = inlined_call_operand.vmem [shape: f32[1,128], index: 3, kind: input, shape index: {}]   ;;  %s1770_s4 = inlined_call_operand.hbm [shape: f32[3,128,128], index: 4, kind: input, shape index: {}]   ;;  %s1771_s5 = inlined_call_operand.vmem [shape: f32[1,128], index: 5, kind: input, shape index: {}]   ;;  %s1772_s6 = inlined_call_operand.vmem [shape: f32[1,128], index: 6, kind: input, shape index: {}]   ;;  %s1773_s7 = inlined_call_operand.hbm [shape: f32[2,16,128], index: 7, kind: output, shape index: {}]  }
   0x1   :  { %13 = vsyncpa [#allocation7], 0 }
   0x2   :  { %14 = vsyncpa [#allocation5], 0 }
   0x3   :  { %16 = vsyncpa [#allocation5 + $0x1], 0  ;;  %s1595_s24 = smov 0   ;;  %s1597_s25 = smov 0  }
   0x4   :  { %s1599_s26 = smov 0   ;;  %s1601_s27 = smov 0  }
   0x5 LB: > { %s1616_s28 = sadd.s32 4294967295, %s1545_s27   ;;  %s1021_s29 = sadd.s32 4294967294, %s1545_s27   ;;  %s1545_s27 = sphi %s1601_s27, %s1787_s27   ;;  %s1541_s26 = sphi %s1599_s26, %s1786_s26   ;;  %s1537_s25 = sphi %s1597_s25, %s1785_s25   ;;  %s1533_s24 = sphi %s1595_s24, %s1784_s24  }
   0x6   : > { %s1620_s30 = sadd.s32 1, %s1545_s27   ;;  %s181_s8 = sadd.s32 1, %s1541_s26 }
   0x7   : > { %s178_s9 = ssub.s32 %s1545_s27, %s1620_s30  ;;  %p191_p0 = scmp.ne.s32.totalorder %s1541_s26, %s1537_s25 }
   0x8   : > { %p179_p1 = scmp.eq.s32.totalorder %s178_s9, 0  ;;  %p192_p2 = scmp.eq.s32.totalorder %s1616_s28, 1 }
   0x9   : > { %p197_p3 = scmp.ne.s32.totalorder %s1537_s25, %s1533_s24  ;;  %p198_p4 = scmp.eq.s32.totalorder %s1021_s29, 1 }
   0xa   : > { %s1631_s10 = scalar_select %p179_p1, %s1541_s26, %s181_s8  }
   0xb   : > { %p1633_p5 = por %p192_p2, %p191_p0  ;;  %p1637_p6 = por %p198_p4, %p197_p3 }
   0xc   : > { %p1022_p7 = scmp.ge.s32.totalorder %s1545_s27, 1  ;;  %p205_p8 = scmp.lt.s32.totalorder %s1545_s27, 3 }
   0xd   : > { %s1776_s12 = scalar_select %p1637_p6, 1, 0 }
   0xe   : > { %p1774_p9 = scmp.eq.s32.totalorder %s1616_s28, 0  ;;  %p1644_p10 = pnand %p1022_p7, %p205_p8 }
   0xf   : > { %s1547_s14 = smov [#allocation3]   ;;  %s1548_s17 = smov [#allocation6]  }
  0x10   : > { %s217_s15 = sshll.u32 %s1547_s14, 4  ;;  %p1370_p11 = pneg %p1644_p10  ;;  %s218_s15 = int_to_ptr.vmem [resolvable:$true] %s217_s15 }
  0x11   : > { %s236_s18 = sshll.u32 %s1548_s17, 4  ;;  %s1436_s19 = scalar_lea.vmem %s218_s15, 6144  ;;  %s237_s18 = int_to_ptr.vmem [resolvable:$true] %s236_s18 }
  0x12   : > { %p1652_p12 = pnand %p1774_p9, %p1370_p11  ;;  %p1437_p0 = scmp.ne.s32.totalorder %s218_s15, %s1436_s19 }
  0x13   : > { %p1444_p3 = scmp.lt.s32.totalorder %s218_s15, %s218_s15  ;;  %p1445_p4 = scmp.lt.s32.totalorder %s1436_s19, %s1436_s19 }
  0x14   : > { %p1427_p13 = pneg %p1652_p12 }
  0x15   : > { %p1446_p7 = por %p1445_p4, %p1444_p3 }
  0x16   : > { %p1439_p1 = pnand %p1437_p0, %p1427_p13 }
  0x18   : > { %p1440_p2 = pneg %p1439_p1 }
  0x1a   : > { %p1447_p8 = pnand %p1446_p7, %p1440_p2 }
  0x1c   : > { %1450 = shalt.err (!%p1447_p8)
}
  0x1d   : > { %s1549_s20 = smov 128   ;;  %s1550_s21 = smov 8  }
  0x1e   : > { %1373 = dma.hbm_to_vmem [thread:$0]  (!%p1652_p12), %s1767_s1, 6144, %s218_s15, [#allocation4], %s1549_s20, %s1549_s20, %s1550_s21  }
  0x1f   : > { %s1462_s29 = scalar_lea.vmem %s237_s18, 6144  ;;  %p1470_p9 = scmp.lt.s32.totalorder %s237_s18, %s237_s18 }
  0x20   : > { %p1463_p11 = scmp.ne.s32.totalorder %s237_s18, %s1462_s29  ;;  %p1471_p6 = scmp.lt.s32.totalorder %s1462_s29, %s1462_s29 }
  0x22   : > { %p1465_p0 = pnand %p1463_p11, %p1427_p13  ;;  %p1472_p3 = por %p1471_p6, %p1470_p9 }
  0x24   : > { %p1466_p1 = pneg %p1465_p0 }
  0x26   : > { %p1473_p2 = pnand %p1472_p3, %p1466_p1 }
  0x28   : > { %1476 = shalt.err (!%p1473_p2)
}
  0x29   : > { %1376 = dma.hbm_to_vmem [thread:$0]  (!%p1652_p12), %s1770_s4, 6144, %s237_s18, [#allocation7], %s1549_s20, %s1549_s20, %s1550_s21  }
  0x2a   : > { %266 = sbr.rel (%p1644_p10) target bundleno = 574 (0x23e), region = 48  ;;  %p1779_p4 = scmp.eq.s32.totalorder (!%p1644_p10), %s1616_s28, 0 }
  0x2f   : > { %1520 = dma.done.wait (%p1779_p4), [#allocation4], 6144   ;;  %p1780_p13 = pmov %p1779_p4 }
  0x30   : > { %p1781_p7 = pmov %p1779_p4 }
  0x31   : > { %1522 = vsyncadd (%p1780_p13), [#allocation4], 4294961152 }
  0x32   : > { %1524 = dma.done.wait (%p1781_p7), [#allocation7], 6144   ;;  %p1782_p6 = pmov %p1779_p4 }
  0x33   : > { %v343_v0 = vld [vmem:[#allocation3 + $0xf8] sm:$0xff]  ;;  %v342_v2 = vld [vmem:[#allocation3 + $0xf0] sm:$0xff]  ;;  %v341_v4 = vld [vmem:[#allocation3 + $0xe8] sm:$0xff]  ;;  %p302_p9 = scmp.lt.s32.totalorder %s1616_s28, 1  ;;  %s299_s22 = sand.u32 1, %s1537_s25  }
  0x34   : > { %1526 = vsyncadd (%p1782_p6), [#allocation7], 4294961152  ;;  %v324_v1 = vld [vmem:[#allocation3 + $0x78] sm:$0xff]  ;;  %1149 = vmatprep.subr.mxu0 %v343_v0  ;;  %v323_v3 = vld [vmem:[#allocation3 + $0x70] sm:$0xff]  ;;  %s1029_s8 = sshll.u32 %s299_s22, 4  ;;  %s1726_s20 = scalar_lea.sflag [#allocation5], %s299_s22 }
  0x35   : > { %1184 = vmatprep.subr.mxu1 %v324_v1  ;;  %1150 = vmatpush3.msra.mxu0 %v343_v0  ;;  %v322_v5 = vld [vmem:[#allocation3 + $0x68] sm:$0xff]  ;;  %v340_v6 = vld [vmem:[#allocation3 + $0xe0] sm:$0xff]  ;;  %v339_v8 = vld [vmem:[#allocation3 + $0xd8] sm:$0xff]  ;;  %s303_s13 = scalar_select %p302_p9, %s1616_s28, 1 }
  0x36   : > { %1185 = vmatpush3.msra.mxu1 %v324_v1  ;;  %1151 = vmatprep.subr.mxu0 %v342_v2  ;;  %v321_v7 = vld [vmem:[#allocation3 + $0x60] sm:$0xff]  ;;  %v320_v9 = vld [vmem:[#allocation3 + $0x58] sm:$0xff]  ;;  %v338_v10 = vld [vmem:[#allocation3 + $0xd0] sm:$0xff]  ;;  %s301_s15 = scalar_lea.vmem [#allocation8], %s1029_s8  ;;  %s1552_s21 = smov [#allocation8]  }
  0x37   : > { %1186 = vmatprep.subr.mxu1 %v323_v3  ;;  %1152 = vmatpush3.msra.mxu0 %v342_v2  ;;  %v319_v11 = vld [vmem:[#allocation3 + $0x50] sm:$0xff]  ;;  %v337_v12 = vld [vmem:[#allocation3 + $0xc8] sm:$0xff]  ;;  %v336_v14 = vld [vmem:[#allocation3 + $0xc0] sm:$0xff]  ;;  %s1359_s14 = smul.u32 24, %s303_s13  ;;  %s937_s16 = sshll.u32 %s301_s15, 4  ;;  %s1724_s16 = int_to_ptr.vmem [resolvable:$true] %s937_s16 }
  0x38   : > { %1187 = vmatpush3.msra.mxu1 %v323_v3  ;;  %1153 = vmatprep.subr.mxu0 %v341_v4  ;;  %v318_v13 = vld [vmem:[#allocation3 + $0x48] sm:$0xff]  ;;  %v317_v15 = vld [vmem:[#allocation3 + $0x40] sm:$0xff]  ;;  %v335_v16 = vld [vmem:[#allocation3 + $0xb8] sm:$0xff]  ;;  %s1481_s23 = sshll.u32 %s1552_s21, 4  ;;  %s1482_s23 = int_to_ptr.vmem [resolvable:$false] %s1481_s23 }
  0x39   : > { %1188 = vmatprep.subr.mxu1 %v322_v5  ;;  %1154 = vmatpush3.msra.mxu0 %v341_v4  ;;  %v316_v17 = vld [vmem:[#allocation3 + $0x38] sm:$0xff]  ;;  %v334_v18 = vld [vmem:[#allocation3 + $0xb0] sm:$0xff]  ;;  %v333_v20 = vld [vmem:[#allocation3 + $0xa8] sm:$0xff]  ;;  %s1689_s17 = scalar_lea.vmem %s1766_s0, %s1359_s14  ;;  %s1040_s14 = sshll.u32 %s1616_s28, 8 }
  0x3a   : > { %1189 = vmatpush3.msra.mxu1 %v322_v5  ;;  %1155 = vmatprep.subr.mxu0 %v340_v6  ;;  %v315_v19 = vld [vmem:[#allocation3 + $0x30] sm:$0xff]  ;;  %v314_v21 = vld [vmem:[#allocation3 + $0x28] sm:$0xff]  ;;  %v332_v22 = vld [vmem:[#allocation3 + $0xa0] sm:$0xff]  ;;  %s1722_s19 = scalar_lea.hbm %s1773_s7, %s1040_s14  ;;  %s1477_s28 = scalar_lea.vmem %s1724_s16, 256 }
  0x3b   : > { %1190 = vmatprep.subr.mxu1 %v321_v7  ;;  %1156 = vmatpush3.msra.mxu0 %v340_v6  ;;  %v313_v23 = vld [vmem:[#allocation3 + $0x20] sm:$0xff]  ;;  %v331_v24 = vld [vmem:[#allocation3 + $0x98] sm:$0xff]  ;;  %v330_v26 = vld [vmem:[#allocation3 + $0x90] sm:$0xff]  ;;  %p1478_p10 = scmp.ne.s32.totalorder %s1724_s16, %s1477_s28  ;;  %s1483_s29 = scalar_lea.vmem %s1482_s23, 512 }
  0x3c   : > { %1191 = vmatpush3.msra.mxu1 %v321_v7  ;;  %1157 = vmatprep.subr.mxu0 %v339_v8  ;;  %v312_v25 = vld [vmem:[#allocation3 + $0x18] sm:$0xff]  ;;  %v311_v27 = vld [vmem:[#allocation3 + $0x10] sm:$0xff]  ;;  %v329_v28 = vld [vmem:[#allocation3 + $0x88] sm:$0xff]  ;;  %p1484_p11 = scmp.lt.s32.totalorder %s1724_s16, %s1482_s23  ;;  %p1485_p0 = scmp.lt.s32.totalorder %s1483_s29, %s1477_s28 }
  0x3d   : > { %1192 = vmatprep.subr.mxu1 %v320_v9  ;;  %1158 = vmatpush3.msra.mxu0 %v339_v8  ;;  %v310_v29 = vld [vmem:[#allocation3 + $0x8] sm:$0xff]  ;;  %v328_v30 = vld [vmem:[#allocation3 + $0x80] sm:$0xff]  ;;  %v512_v36 = vld [vmem:[#allocation3 + $0x178] sm:$0xff]  ;;  %p1479_p12 = pnand %p1478_p10, %p1633_p5 }
  0x3e   : > { %1193 = vmatpush3.msra.mxu1 %v320_v9  ;;  %1159 = vmatprep.subr.mxu0 %v338_v10  ;;  %v309_v31 = vld [vmem:[#allocation3] sm:$0xff]  ;;  %v1696_v34 = vld [vmem:[%s1689_s17 + $0x9] sm:$0xff]  ;;  %v508_v41 = vld [vmem:[#allocation3 + $0x158] sm:$0xff]  ;;  %p1486_p1 = por %p1485_p0, %p1484_p11 }
  0x3f   : > { %1194 = vmatprep.subr.mxu1 %v319_v11  ;;  %1160 = vmatpush3.msra.mxu0 %v338_v10  ;;  %v1692_v32 = vld [vmem:[%s1689_s17 + $0x1] sm:$0xff]  ;;  %v511_v38 = vld [vmem:[#allocation3 + $0x170] sm:$0xff]  ;;  %v504_v45 = vld [vmem:[#allocation3 + $0x138] sm:$0xff]  ;;  %p1480_p8 = pneg %p1479_p12 }
  0x40   : > { %1195 = vmatpush3.msra.mxu1 %v319_v11  ;;  %1161 = vmatprep.subr.mxu0 %v337_v12  ;;  %v307_v33 = vld [vmem:[%s1689_s17] sm:$0xff]  ;;  %v308_v35 = vld [vmem:[%s1689_s17 + $0x8] sm:$0xff]  ;;  %v507_v42 = vld [vmem:[#allocation3 + $0x150] sm:$0xff] }
  0x41   : > { %1196 = vmatprep.subr.mxu1 %v318_v13  ;;  %1162 = vmatpush3.msra.mxu0 %v337_v12  ;;  %v494_v37 = vld [vmem:[%s1689_s17 + $0x2] sm:$0xff]  ;;  %v503_v46 = vld [vmem:[#allocation3 + $0x130] sm:$0xff]  ;;  %v500_v49 = vld [vmem:[#allocation3 + $0x118] sm:$0xff]  ;;  %p1487_p3 = pnand %p1486_p1, %p1480_p8 }
  0x42   : > { %1197 = vmatpush3.msra.mxu1 %v318_v13  ;;  %1163 = vmatprep.subr.mxu0 %v336_v14  ;;  %v510_v39 = vld [vmem:[#allocation3 + $0x168] sm:$0xff]  ;;  %v509_v40 = vld [vmem:[#allocation3 + $0x160] sm:$0xff]  ;;  %v499_v50 = vld [vmem:[#allocation3 + $0x110] sm:$0xff] }
  0x43   : > { %1198 = vmatprep.subr.mxu1 %v317_v15  ;;  %1164 = vmatpush3.msra.mxu0 %v336_v14  ;;  %v506_v43 = vld [vmem:[#allocation3 + $0x148] sm:$0xff]  ;;  %v505_v44 = vld [vmem:[#allocation3 + $0x140] sm:$0xff]  ;;  %v650_v54 = vld [vmem:[#allocation6 + $0xf8] sm:$0xff] }
  0x44   : > { %1199 = vmatpush3.msra.mxu1 %v317_v15  ;;  %1165 = vmatprep.subr.mxu0 %v335_v16  ;;  %v502_v47 = vld [vmem:[#allocation3 + $0x128] sm:$0xff]  ;;  %v501_v48 = vld [vmem:[#allocation3 + $0x120] sm:$0xff]  ;;  %v631_v55 = vld [vmem:[#allocation6 + $0x78] sm:$0xff] }
  0x45   : > { %1200 = vmatprep.subr.mxu1 %v316_v17  ;;  %1166 = vmatpush3.msra.mxu0 %v335_v16  ;;  %v498_v51 = vld [vmem:[#allocation3 + $0x108] sm:$0xff]  ;;  %v497_v52 = vld [vmem:[#allocation3 + $0x100] sm:$0xff]  ;;  %v649_v56 = vld [vmem:[#allocation6 + $0xf0] sm:$0xff] }
  0x46   : > { %1201 = vmatpush3.msra.mxu1 %v316_v17  ;;  %1167 = vmatprep.subr.mxu0 %v334_v18  ;;  %v495_v53 = vld [vmem:[%s1689_s17 + $0xa] sm:$0xff]  ;;  %v647_v60 = vld [vmem:[#allocation6 + $0xe0] sm:$0xff]  ;;  %v646_v62 = vld [vmem:[#allocation6 + $0xd8] sm:$0xff] }
  0x47   : > { %1202 = vmatprep.subr.mxu1 %v315_v19  ;;  %1168 = vmatpush3.msra.mxu0 %v334_v18  ;;  %v630_v57 = vld [vmem:[#allocation6 + $0x70] sm:$0xff]  ;;  %v648_v58 = vld [vmem:[#allocation6 + $0xe8] sm:$0xff]  ;;  %v628_v61 = vld [vmem:[#allocation6 + $0x60] sm:$0xff]  ;;  %v1551_v18 = vmov 0.0  }
  0x48   : > { %1203 = vmatpush3.msra.mxu1 %v315_v19  ;;  %1169 = vmatprep.subr.mxu0 %v333_v20  ;;  %v629_v59 = vld [vmem:[#allocation6 + $0x68] sm:$0xff]  ;;  %v627_v63 = vld [vmem:[#allocation6 + $0x58] sm:$0xff]  ;;  %v645_v0 = vld [vmem:[#allocation6 + $0xd0] sm:$0xff]  ;;  %610 = vst [vmem:[#allocation2] sm:$0xff] %v1551_v18 }
  0x49   : > { %1204 = vmatprep.subr.mxu1 %v314_v21  ;;  %1170 = vmatpush3.msra.mxu0 %v333_v20  ;;  %v626_v1 = vld [vmem:[#allocation6 + $0x50] sm:$0xff]  ;;  %v644_v2 = vld [vmem:[#allocation6 + $0xc8] sm:$0xff]  ;;  %v643_v3 = vld [vmem:[#allocation6 + $0xc0] sm:$0xff]  ;;  %611 = vst [vmem:[#allocation2 + $0x18] sm:$0xff] %v1551_v18 }
  0x4a   : > { %1205 = vmatpush3.msra.mxu1 %v314_v21  ;;  %1171 = vmatprep.subr.mxu0 %v332_v22  ;;  %v642_v4 = vld [vmem:[#allocation6 + $0xb8] sm:$0xff]  ;;  %v641_v5 = vld [vmem:[#allocation6 + $0xb0] sm:$0xff]  ;;  %v640_v6 = vld [vmem:[#allocation6 + $0xa8] sm:$0xff] }
  0x4b   : > { %1206 = vmatprep.subr.mxu1 %v313_v23  ;;  %1172 = vmatpush3.msra.mxu0 %v332_v22  ;;  %v625_v7 = vld [vmem:[#allocation6 + $0x48] sm:$0xff]  ;;  %v639_v8 = vld [vmem:[#allocation6 + $0xa0] sm:$0xff]  ;;  %v638_v10 = vld [vmem:[#allocation6 + $0x98] sm:$0xff] }
  0x4c   : > { %1207 = vmatpush3.msra.mxu1 %v313_v23  ;;  %1173 = vmatprep.subr.mxu0 %v331_v24  ;;  %v624_v9 = vld [vmem:[#allocation6 + $0x40] sm:$0xff]  ;;  %v623_v11 = vld [vmem:[#allocation6 + $0x38] sm:$0xff]  ;;  %v637_v12 = vld [vmem:[#allocation6 + $0x90] sm:$0xff] }
  0x4d   : > { %1208 = vmatprep.subr.mxu1 %v312_v25  ;;  %1174 = vmatpush3.msra.mxu0 %v331_v24  ;;  %v622_v13 = vld [vmem:[#allocation6 + $0x30] sm:$0xff]  ;;  %v636_v14 = vld [vmem:[#allocation6 + $0x88] sm:$0xff]  ;;  %v635_v16 = vld [vmem:[#allocation6 + $0x80] sm:$0xff] }
  0x4e   : > { %1209 = vmatpush3.msra.mxu1 %v312_v25  ;;  %1175 = vmatprep.subr.mxu0 %v330_v26  ;;  %v621_v15 = vld [vmem:[#allocation6 + $0x28] sm:$0xff]  ;;  %v620_v17 = vld [vmem:[#allocation6 + $0x20] sm:$0xff]  ;;  %v819_v19 = vld [vmem:[#allocation6 + $0x178] sm:$0xff] }
  0x4f   : > { %1210 = vmatprep.subr.mxu1 %v311_v27  ;;  %1176 = vmatpush3.msra.mxu0 %v330_v26  ;;  %v619_v20 = vld [vmem:[#allocation6 + $0x18] sm:$0xff]  ;;  %v618_v21 = vld [vmem:[#allocation6 + $0x10] sm:$0xff]  ;;  %v617_v22 = vld [vmem:[#allocation6 + $0x8] sm:$0xff] }
  0x50   : > { %1211 = vmatpush3.msra.mxu1 %v311_v27  ;;  %1177 = vmatprep.subr.mxu0 %v329_v28  ;;  %v616_v23 = vld [vmem:[#allocation6] sm:$0xff] }
  0x51   : > { %1212 = vmatprep.subr.mxu1 %v310_v29  ;;  %1178 = vmatpush3.msra.mxu0 %v329_v28 }
  0x52   : > { %1213 = vmatpush3.msra.mxu1 %v310_v29  ;;  %1179 = vmatprep.subr.mxu0 %v328_v30 }
  0x53   : > { %1214 = vmatprep.subr.mxu1 %v309_v31  ;;  %1180 = vmatpush3.msra.mxu0 %v328_v30  ;;  %v1031_v30 = vld [vmem:[%s1768_s2] ss:$0 sm:$0xff] }
  0x54   : > { %1181 = vmatprep.mubr.f32.mxu0 %v1692_v32  ;;  %1215 = vmatpush3.msra.mxu1 %v309_v31 }
  0x55   : > { %1216 = vmatprep.mubr.f32.mxu1 %v307_v33  ;;  %1182 = vmatmul.mubr.f32.vlgmr.msra.gmra.mxu0 %v1696_v34 }
  0x56   : > { %1217 = vmatmul.mubr.f32.vlgmr.msra.gmra.mxu1 %v308_v35  ;;  %1219 = vmatprep.subr.mxu0 %v512_v36  ;;  %v1032_v35 = vld [vmem:[%s1769_s3] ss:$0 sm:$0xff] }
  0x57   : > { %1251 = vmatprep.mubr.f32.mxu0 %v494_v37  ;;  %1220 = vmatpush3.msra.mxu0 %v512_v36 }
  0x58   : > { %1221 = vmatprep.subr.mxu0 %v511_v38  ;;  %1254 = vmatprep.subr.mxu1 %v650_v54 }
  0x59   : > { %1222 = vmatpush3.msra.mxu0 %v511_v38  ;;  %1255 = vmatpush3.msra.mxu1 %v650_v54  ;;  %v811_v54 = vld [vmem:[#allocation6 + $0x138] sm:$0xff] }
  0x5a   : > { %1223 = vmatprep.subr.mxu0 %v510_v39  ;;  %1256 = vmatprep.subr.mxu1 %v649_v56 }
  0x5b   : > { %1224 = vmatpush3.msra.mxu0 %v510_v39  ;;  %1257 = vmatpush3.msra.mxu1 %v649_v56  ;;  %v809_v56 = vld [vmem:[#allocation6 + $0x128] sm:$0xff] }
  0x5c   : > { %1225 = vmatprep.subr.mxu0 %v509_v40  ;;  %1258 = vmatprep.subr.mxu1 %v648_v58 }
  0x5d   : > { %1226 = vmatpush3.msra.mxu0 %v509_v40  ;;  %1259 = vmatpush3.msra.mxu1 %v648_v58  ;;  %v807_v58 = vld [vmem:[#allocation6 + $0x118] sm:$0xff] }
  0x5e   : > { %1227 = vmatprep.subr.mxu0 %v508_v41  ;;  %1260 = vmatprep.subr.mxu1 %v647_v60 }
  0x5f   : > { %1228 = vmatpush3.msra.mxu0 %v508_v41  ;;  %1261 = vmatpush3.msra.mxu1 %v647_v60  ;;  %v805_v60 = vld [vmem:[#allocation6 + $0x108] sm:$0xff] }
  0x60   : > { %1229 = vmatprep.subr.mxu0 %v507_v42  ;;  %1262 = vmatprep.subr.mxu1 %v646_v62 }
  0x61   : > { %1230 = vmatpush3.msra.mxu0 %v507_v42  ;;  %1263 = vmatpush3.msra.mxu1 %v646_v62 }
  0x62   : > { %1231 = vmatprep.subr.mxu0 %v506_v43  ;;  %1264 = vmatprep.subr.mxu1 %v645_v0 }
  0x63   : > { %1232 = vmatpush3.msra.mxu0 %v506_v43  ;;  %1265 = vmatpush3.msra.mxu1 %v645_v0 }
  0x64   : > { %1233 = vmatprep.subr.mxu0 %v505_v44  ;;  %1266 = vmatprep.subr.mxu1 %v644_v2 }
  0x65   : > { %1234 = vmatpush3.msra.mxu0 %v505_v44  ;;  %1267 = vmatpush3.msra.mxu1 %v644_v2  ;;  %v818_v44 = vld [vmem:[#allocation6 + $0x170] sm:$0xff] }
  0x66   : > { %1235 = vmatprep.subr.mxu0 %v504_v45  ;;  %1268 = vmatprep.subr.mxu1 %v643_v3 }
  0x67   : > { %1236 = vmatpush3.msra.mxu0 %v504_v45  ;;  %1269 = vmatpush3.msra.mxu1 %v643_v3  ;;  %v817_v45 = vld [vmem:[#allocation6 + $0x168] sm:$0xff] }
  0x68   : > { %1237 = vmatprep.subr.mxu0 %v503_v46  ;;  %1270 = vmatprep.subr.mxu1 %v642_v4 }
  0x69   : > { %1238 = vmatpush3.msra.mxu0 %v503_v46  ;;  %1271 = vmatpush3.msra.mxu1 %v642_v4  ;;  %v816_v46 = vld [vmem:[#allocation6 + $0x160] sm:$0xff] }
  0x6a   : > { %1239 = vmatprep.subr.mxu0 %v502_v47  ;;  %1272 = vmatprep.subr.mxu1 %v641_v5 }
  0x6b   : > { %1240 = vmatpush3.msra.mxu0 %v502_v47  ;;  %1273 = vmatpush3.msra.mxu1 %v641_v5  ;;  %v815_v47 = vld [vmem:[#allocation6 + $0x158] sm:$0xff]  ;;  %v1033_v5 = vld [vmem:[%s1771_s5] ss:$0 sm:$0xff] }
  0x6c   : > { %1241 = vmatprep.subr.mxu0 %v501_v48  ;;  %1274 = vmatprep.subr.mxu1 %v640_v6 }
  0x6d   : > { %1242 = vmatpush3.msra.mxu0 %v501_v48  ;;  %1275 = vmatpush3.msra.mxu1 %v640_v6 }
  0x6e   : > { %1243 = vmatprep.subr.mxu0 %v500_v49  ;;  %1276 = vmatprep.subr.mxu1 %v639_v8 }
  0x6f   : > { %1244 = vmatpush3.msra.mxu0 %v500_v49  ;;  %1277 = vmatpush3.msra.mxu1 %v639_v8  ;;  %v1034_v8 = vld [vmem:[%s1772_s6] ss:$0 sm:$0xff] }
  0x70   : > { %1245 = vmatprep.subr.mxu0 %v499_v50  ;;  %1278 = vmatprep.subr.mxu1 %v638_v10 }
  0x71   : > { %1246 = vmatpush3.msra.mxu0 %v499_v50  ;;  %1279 = vmatpush3.msra.mxu1 %v638_v10 }
  0x72   : > { %1247 = vmatprep.subr.mxu0 %v498_v51  ;;  %1280 = vmatprep.subr.mxu1 %v637_v12 }
  0x73   : > { %1248 = vmatpush3.msra.mxu0 %v498_v51  ;;  %1281 = vmatpush3.msra.mxu1 %v637_v12  ;;  %v814_v51 = vld [vmem:[#allocation6 + $0x150] sm:$0xff] }
  0x74   : > { %1249 = vmatprep.subr.mxu0 %v497_v52  ;;  %1282 = vmatprep.subr.mxu1 %v636_v14 }
  0x75   : > { %1250 = vmatpush3.msra.mxu0 %v497_v52  ;;  %1283 = vmatpush3.msra.mxu1 %v636_v14  ;;  %v813_v52 = vld [vmem:[#allocation6 + $0x148] sm:$0xff] }
  0x76   : > { %1252 = vmatmul.mubr.f32.vlgmr.msra.gmra.mxu0 %v495_v53  ;;  %1289 = vmatprep.subr.mxu0 %v631_v55  ;;  %v812_v53 = vld [vmem:[#allocation6 + $0x140] sm:$0xff] }
  0x77   : > { %1290 = vmatpush3.msra.mxu0 %v631_v55  ;;  %1284 = vmatprep.subr.mxu1 %v635_v16  ;;  %v810_v55 = vld [vmem:[#allocation6 + $0x130] sm:$0xff] }
  0x78   : > { %1291 = vmatprep.subr.mxu0 %v630_v57  ;;  %1285 = vmatpush3.msra.mxu1 %v635_v16 }
  0x79   : > { %1292 = vmatpush3.msra.mxu0 %v630_v57  ;;  %1324 = vmatprep.subr.mxu1 %v819_v19  ;;  %v808_v57 = vld [vmem:[#allocation6 + $0x120] sm:$0xff] }
  0x7a   : > { %1293 = vmatprep.subr.mxu0 %v629_v59 }
  0x7b   : > { %1294 = vmatpush3.msra.mxu0 %v629_v59  ;;  %v806_v59 = vld [vmem:[#allocation6 + $0x110] sm:$0xff] }
  0x7c   : > { %1295 = vmatprep.subr.mxu0 %v628_v61 }
  0x7d   : > { %1296 = vmatpush3.msra.mxu0 %v628_v61  ;;  %v804_v61 = vld [vmem:[#allocation6 + $0x100] sm:$0xff] }
  0x7e   : > { %1297 = vmatprep.subr.mxu0 %v627_v63 }
  0x7f   : > { %1298 = vmatpush3.msra.mxu0 %v627_v63 }
  0x80   : > { %1299 = vmatprep.subr.mxu0 %v626_v1 }
  0x81   : > { %1300 = vmatpush3.msra.mxu0 %v626_v1 }
  0x82   : > { %1301 = vmatprep.subr.mxu0 %v625_v7 }
  0x83   : > { %1302 = vmatpush3.msra.mxu0 %v625_v7 }
  0x84   : > { %1303 = vmatprep.subr.mxu0 %v624_v9 }
  0x85   : > { %1304 = vmatpush3.msra.mxu0 %v624_v9 }
  0x86   : > { %1305 = vmatprep.subr.mxu0 %v623_v11 }
  0x87   : > { %1306 = vmatpush3.msra.mxu0 %v623_v11 }
  0x88   : > { %1307 = vmatprep.subr.mxu0 %v622_v13 }
  0x89   : > { %1308 = vmatpush3.msra.mxu0 %v622_v13 }
  0x8a   : > { %1309 = vmatprep.subr.mxu0 %v621_v15 }
  0x8b   : > { %1310 = vmatpush3.msra.mxu0 %v621_v15 }
  0x8c   : > { %1311 = vmatprep.subr.mxu0 %v620_v17 }
  0x8d   : > { %1312 = vmatpush3.msra.mxu0 %v620_v17 }
  0x8e   : > { %1313 = vmatprep.subr.mxu0 %v619_v20 }
  0x8f   : > { %1314 = vmatpush3.msra.mxu0 %v619_v20 }
  0x90   : > { %1315 = vmatprep.subr.mxu0 %v618_v21 }
  0x91   : > { %1316 = vmatpush3.msra.mxu0 %v618_v21 }
  0x92   : > { %1317 = vmatprep.subr.mxu0 %v617_v22 }
  0x93   : > { %1318 = vmatpush3.msra.mxu0 %v617_v22 }
  0x94   : > { %1319 = vmatprep.subr.mxu0 %v616_v23 }
  0x95   : > { %1320 = vmatpush3.msra.mxu0 %v616_v23 }
 0x115   : > { %v1183_v24 = vpop.f32.mrf.mxu0 }
 0x116   : > { %v1218_v25 = vpop.f32.mrf.mxu1 }
 0x117   : > { %v410_v26 = vpop.f32.mrf.mxu0  ;;  %v491_v28 = vadd.f32 %v1218_v25, %v1183_v24 }
 0x118   : > { %v485_v27 = vpop.f32.mrf.mxu1 }
 0x119   : > { %v486_v31 = vadd.f32 %v485_v27, %v410_v26 }
 0x136   : > { %v1253_v29 = vpop.f32.mrf.mxu0 }
 0x137   : > { %v589_v33 = vadd.f32 %v1253_v29, %v491_v28 }
 0x138   : > { %v579_v36 = vpop.f32.mrf.mxu0 }
 0x139   : > { %v598_v37 = vmul.f32 %v1031_v30, %v589_v33  ;;  %v588_v38 = vadd.f32 %v579_v36, %v486_v31 }
 0x13b   : > { %v607_v39 = vadd.f32 %v1032_v35, %v598_v37  ;;  %v597_v40 = vmul.f32 %v1031_v30, %v588_v38 }
 0x13d   : > { %v609_v41 = vmax.f32 %v607_v39, 0.0  ;;  %v606_v42 = vadd.f32 %v1032_v35, %v597_v40 }
 0x13f   : > { %613 = vst [vmem:[#allocation2 + $0x10] sm:$0xff] %v609_v41  ;;  %v608_v43 = vmax.f32 %v606_v42, 0.0 }
 0x141   : > { %612 = vst [vmem:[#allocation2 + $0x8] sm:$0xff] %v608_v43  ;;  %1286 = vmatprep.mubr.f32.mxu1 %v608_v43 }
 0x142   : > { %1287 = vmatmul.mubr.f32.vlgmr.msra.gmra.mxu1 %v609_v41 }
 0x143   : > { %1325 = vmatpush3.msra.mxu1 %v819_v19 }
 0x144   : > { %1326 = vmatprep.subr.mxu1 %v818_v44 }
 0x145   : > { %1327 = vmatpush3.msra.mxu1 %v818_v44 }
 0x146   : > { %1328 = vmatprep.subr.mxu1 %v817_v45  ;;  %v802_v62 = vld [vmem:[#allocation2 + $0x11] sm:$0xff] }
 0x147   : > { %1329 = vmatpush3.msra.mxu1 %v817_v45 }
 0x148   : > { %v614_v48 = vld [vmem:[#allocation2 + $0x7] sm:$0xff]  ;;  %v615_v49 = vld [vmem:[#allocation2 + $0xf] sm:$0xff]  ;;  %1330 = vmatprep.subr.mxu1 %v816_v46 }
 0x149   : > { %v801_v50 = vld [vmem:[#allocation2 + $0x9] sm:$0xff]  ;;  %1321 = vmatprep.mubr.f32.mxu0 %v614_v48  ;;  %1331 = vmatpush3.msra.mxu1 %v816_v46 }
 0x14a   : > { %1356 = vmatprep.mubr.f32.mxu1 %v801_v50  ;;  %1322 = vmatmul.mubr.f32.vlgmr.msra.gmra.mxu0 %v615_v49 }
 0x14b   : > { %1332 = vmatprep.subr.mxu1 %v815_v47 }
 0x14c   : > { %1333 = vmatpush3.msra.mxu1 %v815_v47 }
 0x14d   : > { %1334 = vmatprep.subr.mxu1 %v814_v51 }
 0x14e   : > { %1335 = vmatpush3.msra.mxu1 %v814_v51 }
 0x14f   : > { %1336 = vmatprep.subr.mxu1 %v813_v52 }
 0x150   : > { %1337 = vmatpush3.msra.mxu1 %v813_v52 }
 0x151   : > { %1338 = vmatprep.subr.mxu1 %v812_v53 }
 0x152   : > { %1339 = vmatpush3.msra.mxu1 %v812_v53 }
 0x153   : > { %1340 = vmatprep.subr.mxu1 %v811_v54 }
 0x154   : > { %1341 = vmatpush3.msra.mxu1 %v811_v54 }
 0x155   : > { %1342 = vmatprep.subr.mxu1 %v810_v55 }
 0x156   : > { %1343 = vmatpush3.msra.mxu1 %v810_v55 }
 0x157   : > { %1344 = vmatprep.subr.mxu1 %v809_v56 }
 0x158   : > { %1345 = vmatpush3.msra.mxu1 %v809_v56 }
 0x159   : > { %1346 = vmatprep.subr.mxu1 %v808_v57 }
 0x15a   : > { %1347 = vmatpush3.msra.mxu1 %v808_v57 }
 0x15b   : > { %1348 = vmatprep.subr.mxu1 %v807_v58 }
 0x15c   : > { %1349 = vmatpush3.msra.mxu1 %v807_v58 }
 0x15d   : > { %1350 = vmatprep.subr.mxu1 %v806_v59 }
 0x15e   : > { %1351 = vmatpush3.msra.mxu1 %v806_v59 }
 0x15f   : > { %1352 = vmatprep.subr.mxu1 %v805_v60 }
 0x160   : > { %1353 = vmatpush3.msra.mxu1 %v805_v60 }
 0x161   : > { %1354 = vmatprep.subr.mxu1 %v804_v61 }
 0x162   : > { %1355 = vmatpush3.msra.mxu1 %v804_v61 }
 0x163   : > { %1357 = vmatmul.mubr.f32.vlgmr.msra.gmra.mxu1 %v802_v62 }
 0x202   : > { %v1288_v63 = vpop.f32.mrf.mxu1 }
 0x204   : > { %v717_v1 = vpop.f32.mrf.mxu1 }
 0x20a   : > { %v1323_v0 = vpop.f32.mrf.mxu0 }
 0x20b   : > { %v798_v3 = vadd.f32 %v1323_v0, %v1288_v63 }
 0x20c   : > { %v792_v2 = vpop.f32.mrf.mxu0 }
 0x20d   : > { %v793_v6 = vadd.f32 %v792_v2, %v717_v1 }
 0x223   : > { %v1358_v4 = vpop.f32.mrf.mxu1 }
 0x224   : > { %v896_v7 = vadd.f32 %v1358_v4, %v798_v3 }
 0x225   : > { %v886_v9 = vpop.f32.mrf.mxu1 }
 0x226   : > { %v907_v10 = vmul.f32 %v1033_v5, %v896_v7  ;;  %v895_v11 = vadd.f32 %v886_v9, %v793_v6 }
 0x228   : > { %v916_v12 = vadd.f32 %v1034_v8, %v907_v10  ;;  %v906_v13 = vmul.f32 %v1033_v5, %v895_v11 }
 0x22a   : > { %v918_v14 = vadd.f32 %v916_v12, %v1696_v34  ;;  %v915_v15 = vadd.f32 %v1034_v8, %v906_v13 }
 0x22c   : > { %v920_v16 = vmax.f32 %v918_v14, 0.0  ;;  %v917_v17 = vadd.f32 %v915_v15, %v1692_v32 }
 0x22e   : > { %922 = vst [vmem:[%s301_s15 + $0x8] sm:$0xff] %v920_v16  ;;  %v919_v18 = vmax.f32 %v917_v17, 0.0 }
 0x230   : > { %921 = vst [vmem:[%s301_s15] sm:$0xff] %v919_v18 }
 0x231   : > { %1490 = shalt.err (!%p1487_p3)
}
 0x232   : > { %s1491_s22 = scalar_lea.hbm %s1722_s19, 256  ;;  %s1495_s13 = scalar_lea.hbm %s1773_s7, 512 }
 0x233   : > { %p1492_p2 = scmp.ne.s32.totalorder %s1722_s19, %s1491_s22  ;;  %p1496_p7 = scmp.lt.s32.totalorder %s1722_s19, %s1773_s7 }
 0x234   : > { %p1497_p6 = scmp.lt.s32.totalorder %s1495_s13, %s1491_s22 }
 0x235   : > { %p1493_p4 = pnand %p1492_p2, %p1633_p5 }
 0x236   : > { %p1498_p9 = por %p1497_p6, %p1496_p7 }
 0x237   : > { %p1494_p13 = pneg %p1493_p4 }
 0x239   : > { %p1499_p10 = pnand %p1498_p9, %p1494_p13 }
 0x23b   : > { %1502 = shalt.err (!%p1499_p10)
}
 0x23c   : > { %s1553_s17 = smov 128   ;;  %s1554_s18 = smov 8  }
 0x23d   : > { %1368 = dma.vmem_to_hbm [thread:$0]  (%p1633_p5), %s1724_s16, 256, %s1722_s19, %s1726_s20, %s1553_s17, %s1553_s17, %s1554_s18  }
 0x23e PF: > { %p1385_p12 = scmp.ge.s32.totalorder %s1545_s27, 2  ;;  %s952_s28 = sand.u32 1, %s1533_s24  }
 0x23f   : > { %p1783_p8 = scmp.ne.s32.totalorder %s1776_s12, 0  ;;  %s953_s21 = scalar_lea.sflag [#allocation5], %s952_s28 }
 0x241   : > { %p1378_p11 = pnand %p1385_p12, %p1783_p8 }
 0x243   : > { %p1379_p0 = pneg %p1378_p11 }
 0x245   : > { %1528 = dma.done.wait (%p1379_p0), %s953_s21, 256  }
 0x246   : > { %1530 = vsyncadd (%p1379_p0), %s953_s21, 4294967040  ;;  %p19_p1 = scmp.ge.s32.totalorder %s1620_s30, 4   ;;  %s1784_s24 = smov %s1537_s25 }
 0x247   : > { %s1785_s25 = smov %s1541_s26  ;;  %s1786_s26 = smov %s1631_s10 }
 0x248   : > { %s1787_s27 = smov %s1620_s30  ;;  %21 = sbr.rel (!%p19_p1) target bundleno = 5 (0x5), region = 96 }
 0x24d   :  { %958 = vsyncpa [#allocation4], 1 }
 0x24e   :  { %960 = vsyncpa [#allocation4 + $0x1], 1 }
 0x24f   :  { %961 = vsyncpa [#allocation7], 1 }
 0x250   :  { %962 = vsyncpa [#allocation5], 1 }
 0x251   :  { %964 = vsyncpa [#allocation5 + $0x1], 1 }

</bundles_post_ra>
